<compile_context>
chip_gen: v7x
topology: tpu7x:2x2x1
jax: 0.10.0
libtpu: 0.0.40
codegen_flags: <defaults>
</compile_context>

<pallas_src>
import functools

import jax
import jax.numpy as jnp
from jax.experimental import pallas as pl
from jax.experimental.pallas import tpu as pltpu

_LANE = 128      # lane width: last dim padded to a multiple of this
_SUBLANE = 8     # sublane width: second-to-last dim multiple
_TILE_B = 256    # batch tile used only when the (padded) batch is large


def _round_up(x: int, m: int) -> int:
    return ((x + m - 1) // m) * m


def _make_mlp_kernel(num_layers: int):
    """Fused kernel: x -> [Linear -> ReLU] * num_layers (Dropout p=0 == identity)."""

    def kernel(*refs):
        # refs = (x_ref, w0_ref, b0_ref, w1_ref, b1_ref, ..., o_ref)
        x_ref = refs[0]
        o_ref = refs[-1]
        h = x_ref[...]
        for i in range(num_layers):
            w_ref = refs[1 + 2 * i]
            b_ref = refs[2 + 2 * i]
            # MXU matmul with f32 accumulation; bias broadcast along sublanes.
            y = jnp.dot(h, w_ref[...], preferred_element_type=jnp.float32)
            y = y + b_ref[...]
            # The PyTorch module applies the activation after EVERY Linear,
            # including the last one.
            h = jnp.maximum(y, 0.0)
        o_ref[...] = h.astype(o_ref.dtype)

    return kernel


def init_mlp_params(key, hidden_dims):
    """Mirror nn.Linear's U(-1/sqrt(fan_in), 1/sqrt(fan_in)) init; weights stored (in, out)."""
    params = []
    for i in range(len(hidden_dims) - 1):
        fan_in, fan_out = hidden_dims[i], hidden_dims[i + 1]
        key, kw, kb = jax.random.split(key, 3)
        bound = 1.0 / jnp.sqrt(jnp.float32(fan_in))
        w_t = jax.random.uniform(kw, (fan_in, fan_out), jnp.float32,
                                 minval=-bound, maxval=bound)
        b = jax.random.uniform(kb, (fan_out,), jnp.float32,
                               minval=-bound, maxval=bound)
        params.append((w_t, b))
    return params


def prepare_params(params):
    """One-time layout prep: zero-pad every feature dim up to a multiple of 128,
    reshape bias to (1, N).  Done once, NOT per forward call."""
    prepped = []
    for w_t, b in params:
        k, n = w_t.shape
        kp, np_ = _round_up(k, _LANE), _round_up(n, _LANE)
        w_pad = jnp.pad(w_t, ((0, kp - k), (0, np_ - n)))
        b_pad = jnp.pad(b, (0, np_ - n)).reshape(1, np_)
        prepped.append((w_pad, b_pad))
    return prepped


@functools.partial(jax.jit, static_argnames=("out_dim",))
def mlp_forward(x, prepped_params, out_dim):
    num_layers = len(prepped_params)
    if num_layers == 0:
        # hidden_dims None / single int -> empty nn.Sequential -> identity.
        return x

    B, K = x.shape
    d0_pad = prepped_params[0][0].shape[0]
    dn_pad = prepped_params[-1][0].shape[1]

    kernel = _make_mlp_kernel(num_layers)
    flat_params = [a for wb in prepped_params for a in wb]

    b_small = _round_up(max(B, 1), _SUBLANE)

    if b_small > _TILE_B:
        # Large batch: pad batch to a tile multiple, tile over the batch axis.
        # 'parallel' lets the grid shard across v7x's two TensorCores; weights
        # and biases use a constant index_map so they stay VMEM-resident and
        # are not re-DMA'd per step.
        b_pad = _round_up(B, _TILE_B)
        x_pad = jnp.pad(x, ((0, b_pad - B), (0, d0_pad - K)))

        in_specs = [pl.BlockSpec((_TILE_B, d0_pad), lambda i: (i, 0))]
        for w_pad, bias_pad in prepped_params:
            kp, np_ = w_pad.shape
            in_specs.append(pl.BlockSpec((kp, np_), lambda i: (0, 0)))
            in_specs.append(pl.BlockSpec((1, np_), lambda i: (0, 0)))
        y_pad = pl.pallas_call(
            kernel,
            out_shape=jax.ShapeDtypeStruct((b_pad, dn_pad), x.dtype),
            grid=(b_pad // _TILE_B,),
            in_specs=in_specs,
            out_specs=pl.BlockSpec((_TILE_B, dn_pad), lambda i: (i, 0)),
            compiler_params=pltpu.CompilerParams(
                dimension_semantics=("parallel",)),
        )(x_pad, *flat_params)
    else:
        # Small problem: single grid-less invocation, everything VMEM-resident,
        # no pipeline prologue/epilogue overhead.
        x_pad = jnp.pad(x, ((0, b_small - B), (0, d0_pad - K)))
        y_pad = pl.pallas_call(
            kernel,
            out_shape=jax.ShapeDtypeStruct((b_small, dn_pad), x.dtype),
        )(x_pad, *flat_params)

    # TODO(synk): for very large hidden dims add (tm, tn, tk) K-tiling with an
    # f32 VMEM accumulator and bf16 operands; unnecessary at these sizes.
    return y_pad[:B, :out_dim]


def mlp_reference(x, params):
    h = x
    for w_t, b in params:
        h = jnp.maximum(h @ w_t + b, 0.0)
    return h


if __name__ == "__main__":
    key = jax.random.PRNGKey(0)
    hidden_dims = [32, 64, 32]   # MultiLayerPerceptron(hidden_dims=[32, 64, 32])
    batch = 8

    key, kx, kp = jax.random.split(key, 3)
    x = jax.random.normal(kx, (batch, hidden_dims[0]), jnp.float32)
    params = init_mlp_params(kp, hidden_dims)
    prepped = prepare_params(params)          # one-time lane-dense layout prep

    out = mlp_forward(x, prepped, hidden_dims[-1])
    out = jax.block_until_ready(out)

    ref = mlp_reference(x, params)
    assert out.shape == (batch, hidden_dims[-1])
    assert jnp.allclose(out, ref, atol=1e-5, rtol=1e-5), "mismatch vs reference"

    print("KERNEL_OK")
</pallas_src>

<mosaic_0001>
module attributes {stable_mosaic.version = 11 : i64} {
  func.func @kernel(%arg0: memref<8x128xf32, #tpu.memory_space<vmem>>, %arg1: memref<128x128xf32, #tpu.memory_space<vmem>>, %arg2: memref<1x128xf32, #tpu.memory_space<vmem>>, %arg3: memref<128x128xf32, #tpu.memory_space<vmem>>, %arg4: memref<1x128xf32, #tpu.memory_space<vmem>>, %arg5: memref<8x128xf32, #tpu.memory_space<vmem>>) attributes {dimension_semantics = [], scalar_prefetch = 0 : i64, scratch_operands = 0 : i64, tpu.core_type = #tpu.core_type<tc>} {
    %c0 = arith.constant 0 : index
    %c0_0 = arith.constant 0 : index
    %0 = vector.load %arg0[%c0, %c0_0] : memref<8x128xf32, #tpu.memory_space<vmem>>, vector<8x128xf32>
    %c0_1 = arith.constant 0 : index
    %c0_2 = arith.constant 0 : index
    %1 = vector.load %arg1[%c0_1, %c0_2] : memref<128x128xf32, #tpu.memory_space<vmem>>, vector<128x128xf32>
    %cst = arith.constant dense<0.000000e+00> : vector<8x128xf32>
    %2 = tpu.matmul %0, %1, %cst {dimension_numbers = #tpu.dot_dimension_numbers<[1], [0], [0], [1], [0, 0, 1, 1], [], []>} : vector<8x128xf32>, vector<128x128xf32>, vector<8x128xf32> -> vector<8x128xf32>
    %c0_3 = arith.constant 0 : index
    %c0_4 = arith.constant 0 : index
    %3 = vector.load %arg2[%c0_3, %c0_4] : memref<1x128xf32, #tpu.memory_space<vmem>>, vector<1x128xf32>
    %4 = vector.broadcast %3 : vector<1x128xf32> to vector<8x128xf32>
    %5 = arith.addf %2, %4 : vector<8x128xf32>
    %cst_5 = arith.constant 0.000000e+00 : f32
    %6 = vector.broadcast %cst_5 : f32 to vector<8x128xf32>
    %7 = arith.maximumf %5, %6 : vector<8x128xf32>
    %c0_6 = arith.constant 0 : index
    %c0_7 = arith.constant 0 : index
    %8 = vector.load %arg3[%c0_6, %c0_7] : memref<128x128xf32, #tpu.memory_space<vmem>>, vector<128x128xf32>
    %cst_8 = arith.constant dense<0.000000e+00> : vector<8x128xf32>
    %9 = tpu.matmul %7, %8, %cst_8 {dimension_numbers = #tpu.dot_dimension_numbers<[1], [0], [0], [1], [0, 0, 1, 1], [], []>} : vector<8x128xf32>, vector<128x128xf32>, vector<8x128xf32> -> vector<8x128xf32>
    %c0_9 = arith.constant 0 : index
    %c0_10 = arith.constant 0 : index
    %10 = vector.load %arg4[%c0_9, %c0_10] : memref<1x128xf32, #tpu.memory_space<vmem>>, vector<1x128xf32>
    %11 = vector.broadcast %10 : vector<1x128xf32> to vector<8x128xf32>
    %12 = arith.addf %9, %11 : vector<8x128xf32>
    %cst_11 = arith.constant 0.000000e+00 : f32
    %13 = vector.broadcast %cst_11 : f32 to vector<8x128xf32>
    %14 = arith.maximumf %12, %13 : vector<8x128xf32>
    %c0_12 = arith.constant 0 : index
    %c0_13 = arith.constant 0 : index
    %15 = vector.load %arg5[%c0_12, %c0_13] : memref<8x128xf32, #tpu.memory_space<vmem>>, vector<8x128xf32>
    tpu.vector_store %arg5[%c0_12, %c0_13], %14 {strides = array<i32>} : memref<8x128xf32, #tpu.memory_space<vmem>>, vector<8x128xf32>,
    return
  }
}

</mosaic_0001>

<bundles_post_ra>
// kernel: mlp_forward.1
= control target key start
LH: loop header
LB: loop body
LE: loop exit
PB: predicated region body
PF: predicated region fallthrough
CT: control target
= control target key end

     0   :  { %10 = vsyncpa [#allocation3], 0  ;;  %s588_s0 = inlined_call_operand.vmem [shape: f32[8,128], index: 0, kind: input, shape index: {}]   ;;  %s589_s1 = inlined_call_operand.hbm [shape: f32[128,128], index: 1, kind: input, shape index: {}]   ;;  %s590_s2 = inlined_call_operand.vmem [shape: f32[1,128], index: 2, kind: input, shape index: {}]   ;;  %s591_s3 = inlined_call_operand.hbm [shape: f32[128,128], index: 3, kind: input, shape index: {}]   ;;  %s592_s4 = inlined_call_operand.vmem [shape: f32[1,128], index: 4, kind: input, shape index: {}]   ;;  %s593_s5 = inlined_call_operand.hbm [shape: f32[8,128], index: 5, kind: output, shape index: {}]  }
   0x1   :  { %11 = vsyncpa [#allocation6], 0 }
   0x2   :  { %12 = vsyncpa [#allocation4], 0  ;;  %s489_s18 = smov [#allocation2]   ;;  %s417_s22 = scalar_lea.hbm %s589_s1, 2048 }
   0x3   :  { %s20_s19 = sshll.u32 %s489_s18, 4  ;;  %p418_p0 = scmp.ne.s32.totalorder %s589_s1, %s417_s22  ;;  %s21_s19 = int_to_ptr.vmem [resolvable:$true] %s20_s19 }
   0x4   :  { %p421_p1 = scmp.lt.u32.totalorder %s417_s22, %s589_s1 }
   0x6   :  { %p423_p2 = pnand %p421_p1, %p418_p0 }
   0x8   :  { %426 = shalt.err (!%p423_p2)
}
   0x9   :  { %s427_s27 = scalar_lea.vmem %s21_s19, 2048  ;;  %p432_p4 = scmp.lt.s32.totalorder %s21_s19, %s21_s19 }
   0xa   :  { %p428_p3 = scmp.ne.s32.totalorder %s21_s19, %s427_s27  ;;  %p433_p5 = scmp.lt.s32.totalorder %s427_s27, %s427_s27 }
   0xc   :  { %p434_p6 = por %p433_p5, %p432_p4 }
   0xe   :  { %p435_p7 = pnand %p434_p6, %p428_p3 }
  0x10   :  { %438 = shalt.err (!%p435_p7)
}
  0x11   :  { %s490_s28 = smov 128   ;;  %s491_s29 = smov 8  }
  0x12   :  { %26 = dma.hbm_to_vmem [thread:$0]  %s589_s1, 2048, %s21_s19, [#allocation3], %s490_s28, %s490_s28, %s491_s29  }
  0x13   :  { %s492_s7 = smov [#allocation5]   ;;  %s439_s11 = scalar_lea.hbm %s591_s3, 2048 }
  0x14   :  { %s34_s8 = sshll.u32 %s492_s7, 4  ;;  %p440_p8 = scmp.ne.s32.totalorder %s591_s3, %s439_s11  ;;  %s35_s8 = int_to_ptr.vmem [resolvable:$true] %s34_s8 }
  0x15   :  { %p443_p9 = scmp.lt.u32.totalorder %s439_s11, %s591_s3 }
  0x17   :  { %p445_p10 = pnand %p443_p9, %p440_p8 }
  0x19   :  { %448 = shalt.err (!%p445_p10)
}
  0x1a   :  { %s449_s16 = scalar_lea.vmem %s35_s8, 2048  ;;  %p454_p12 = scmp.lt.s32.totalorder %s35_s8, %s35_s8 }
  0x1b   :  { %p450_p11 = scmp.ne.s32.totalorder %s35_s8, %s449_s16  ;;  %p455_p13 = scmp.lt.s32.totalorder %s449_s16, %s449_s16 }
  0x1d   :  { %p456_p0 = por %p455_p13, %p454_p12 }
  0x1f   :  { %p457_p1 = pnand %p456_p0, %p450_p11 }
  0x21   :  { %460 = shalt.err (!%p457_p1)
}
  0x22   :  { %40 = dma.hbm_to_vmem [thread:$0]  %s591_s3, 2048, %s35_s8, [#allocation6], %s490_s28, %s490_s28, %s491_s29  }
  0x23   :  { %483 = dma.done.wait [#allocation3], 2048  }
  0x24   :  { %484 = vsyncadd [#allocation3], 4294965248 }
  0x25   :  { %485 = dma.done.wait [#allocation6], 2048  }
  0x26   :  { %486 = vsyncadd [#allocation6], 4294965248  ;;  %v493_v0 = vmov 0.0|0.0   ;;  %vm494_vm0 = vmmov 0   ;;  %v495_v1 = vmov 0.0   ;;  %v50_v2 = vld [vmem:[#allocation2] sm:$0xff] }
  0x27   :  { %361 = vmatprep.subr.bf16.mxu0 %v493_v0  ;;  %323 = vmatprep.mubr.msk.f32.mxu0 %vm494_vm0, %v495_v1  ;;  %v51_v3 = vld [vmem:[#allocation2 + $0x8] sm:$0xff]  ;;  %v52_v4 = vld [vmem:[#allocation2 + $0x10] sm:$0xff]  ;;  %v53_v6 = vld [vmem:[#allocation2 + $0x18] sm:$0xff] }
  0x28   :  { %385 = vmatprep.subr.bf16.mxu1 %v493_v0  ;;  %358 = vmatprep.mubr.msk.f32.mxu1 %vm494_vm0, %v495_v1  ;;  %v362_v5 = vpack.c.bf16 %v51_v3, %v50_v2  ;;  %v365_v7 = vpack.c.bf16 %v53_v6, %v52_v4  ;;  %v54_v8 = vld [vmem:[#allocation2 + $0x20] sm:$0xff]  ;;  %v55_v9 = vld [vmem:[#allocation2 + $0x28] sm:$0xff]  ;;  %v146_v12 = vld [vmem:[#allocation5 + $0x10] sm:$0xff] }
  0x29   :  { %v144_v10 = vld [vmem:[#allocation5] sm:$0xff]  ;;  %v145_v11 = vld [vmem:[#allocation5 + $0x8] sm:$0xff]  ;;  %v147_v13 = vld [vmem:[#allocation5 + $0x18] sm:$0xff]  ;;  %v368_v14 = vpack.c.bf16 %v55_v9, %v54_v8 }
  0x2a   :  { %363 = vmatpush3.bf16.msra.mxu0 %v362_v5  ;;  %v386_v15 = vpack.c.bf16 %v145_v11, %v144_v10  ;;  %v56_v16 = vld [vmem:[#allocation2 + $0x30] sm:$0xff]  ;;  %v57_v17 = vld [vmem:[#allocation2 + $0x38] sm:$0xff]  ;;  %v389_v18 = vpack.c.bf16 %v147_v13, %v146_v12  ;;  %v148_v19 = vld [vmem:[#allocation5 + $0x20] sm:$0xff] }
  0x2b   :  { %364 = vmatprep.subr.bf16.mxu0 %v493_v0  ;;  %v149_v20 = vld [vmem:[#allocation5 + $0x28] sm:$0xff]  ;;  %v371_v21 = vpack.c.bf16 %v57_v17, %v56_v16  ;;  %v58_v22 = vld [vmem:[#allocation2 + $0x40] sm:$0xff]  ;;  %v150_v25 = vld [vmem:[#allocation5 + $0x30] sm:$0xff] }
  0x2c   :  { %387 = vmatpush3.bf16.msra.mxu1 %v386_v15  ;;  %v59_v23 = vld [vmem:[#allocation2 + $0x48] sm:$0xff]  ;;  %v392_v24 = vpack.c.bf16 %v149_v20, %v148_v19  ;;  %v151_v26 = vld [vmem:[#allocation5 + $0x38] sm:$0xff]  ;;  %v60_v28 = vld [vmem:[#allocation2 + $0x50] sm:$0xff] }
  0x2d   :  { %388 = vmatprep.subr.bf16.mxu1 %v493_v0  ;;  %v374_v27 = vpack.c.bf16 %v59_v23, %v58_v22  ;;  %v61_v29 = vld [vmem:[#allocation2 + $0x58] sm:$0xff]  ;;  %v395_v30 = vpack.c.bf16 %v151_v26, %v150_v25  ;;  %v152_v31 = vld [vmem:[#allocation5 + $0x40] sm:$0xff]  ;;  %v153_v32 = vld [vmem:[#allocation5 + $0x48] sm:$0xff] }
  0x2e   :  { %366 = vmatpush3.bf16.msra.mxu0 %v365_v7  ;;  %v377_v33 = vpack.c.bf16 %v61_v29, %v60_v28  ;;  %v62_v34 = vld [vmem:[#allocation2 + $0x60] sm:$0xff]  ;;  %v63_v35 = vld [vmem:[#allocation2 + $0x68] sm:$0xff]  ;;  %v398_v36 = vpack.c.bf16 %v153_v32, %v152_v31  ;;  %v154_v37 = vld [vmem:[#allocation5 + $0x50] sm:$0xff] }
  0x2f   :  { %367 = vmatprep.subr.bf16.mxu0 %v493_v0  ;;  %v155_v38 = vld [vmem:[#allocation5 + $0x58] sm:$0xff]  ;;  %v380_v39 = vpack.c.bf16 %v63_v35, %v62_v34  ;;  %v64_v40 = vld [vmem:[#allocation2 + $0x70] sm:$0xff]  ;;  %v156_v43 = vld [vmem:[#allocation5 + $0x60] sm:$0xff] }
  0x30   :  { %390 = vmatpush3.bf16.msra.mxu1 %v389_v18  ;;  %v65_v41 = vld [vmem:[#allocation2 + $0x78] sm:$0xff]  ;;  %v401_v42 = vpack.c.bf16 %v155_v38, %v154_v37  ;;  %v157_v44 = vld [vmem:[#allocation5 + $0x68] sm:$0xff]  ;;  %v158_v48 = vld [vmem:[#allocation5 + $0x70] sm:$0xff] }
  0x31   :  { %391 = vmatprep.subr.bf16.mxu1 %v493_v0  ;;  %v383_v45 = vpack.c.bf16 %v65_v41, %v64_v40  ;;  %v404_v46 = vpack.c.bf16 %v157_v44, %v156_v43  ;;  %v49_v47 = vld [vmem:[%s588_s0] sm:$0xff]  ;;  %s496_s0 = smov [#allocation7]  }
  0x32   :  { %369 = vmatpush3.bf16.msra.mxu0 %v368_v14  ;;  %v159_v49 = vld [vmem:[#allocation5 + $0x78] sm:$0xff]  ;;  %s245_s23 = sshll.u32 %s496_s0, 4  ;;  %s246_s23 = int_to_ptr.vmem [resolvable:$true] %s245_s23 }
  0x33   :  { %370 = vmatprep.subr.bf16.mxu0 %v493_v0  ;;  %v407_v50 = vpack.c.bf16 %v159_v49, %v158_v48  ;;  %v255_v51 = vld [vmem:[%s590_s2] ss:$0 sm:$0xff]  ;;  %s461_s24 = scalar_lea.vmem %s246_s23, 128  ;;  %p466_p3 = scmp.lt.s32.totalorder %s246_s23, %s246_s23 }
  0x34   :  { %393 = vmatpush3.bf16.msra.mxu1 %v392_v24  ;;  %v256_v56 = vld [vmem:[%s592_s4] ss:$0 sm:$0xff]  ;;  %p462_p2 = scmp.ne.s32.totalorder %s246_s23, %s461_s24  ;;  %p467_p4 = scmp.lt.s32.totalorder %s461_s24, %s461_s24 }
  0x35   :  { %394 = vmatprep.subr.bf16.mxu1 %v493_v0 }
  0x36   :  { %372 = vmatpush3.bf16.msra.mxu0 %v371_v21  ;;  %p468_p5 = por %p467_p4, %p466_p3 }
  0x37   :  { %373 = vmatprep.subr.bf16.mxu0 %v493_v0 }
  0x38   :  { %396 = vmatpush3.bf16.msra.mxu1 %v395_v30  ;;  %p469_p6 = pnand %p468_p5, %p462_p2 }
  0x39   :  { %397 = vmatprep.subr.bf16.mxu1 %v493_v0 }
  0x3a   :  { %375 = vmatpush3.bf16.msra.mxu0 %v374_v27 }
  0x3b   :  { %376 = vmatprep.subr.bf16.mxu0 %v493_v0 }
  0x3c   :  { %399 = vmatpush3.bf16.msra.mxu1 %v398_v36 }
  0x3d   :  { %400 = vmatprep.subr.bf16.mxu1 %v493_v0 }
  0x3e   :  { %378 = vmatpush3.bf16.msra.mxu0 %v377_v33 }
  0x3f   :  { %379 = vmatprep.subr.bf16.mxu0 %v493_v0 }
  0x40   :  { %402 = vmatpush3.bf16.msra.mxu1 %v401_v42 }
  0x41   :  { %403 = vmatprep.subr.bf16.mxu1 %v493_v0 }
  0x42   :  { %381 = vmatpush3.bf16.msra.mxu0 %v380_v39 }
  0x43   :  { %382 = vmatprep.subr.bf16.mxu0 %v493_v0 }
  0x44   :  { %405 = vmatpush3.bf16.msra.mxu1 %v404_v46 }
  0x45   :  { %406 = vmatprep.subr.bf16.mxu1 %v493_v0 }
  0x46   :  { %384 = vmatpush3.bf16.msra.mxu0 %v383_v45 }
  0x48   :  { %408 = vmatpush3.bf16.msra.mxu1 %v407_v50 }
  0x49   :  { %324 = vmatmul.mubr.f32.vlgmr.msra.gmra.mrb[0].mxu0 %v49_v47 }
 0x11c   :  { %v139_v52 = vpop.f32.mrb[0].mxu0 }
 0x11d   :  { %v140_v53 = vadd.f32 %v255_v51, %v139_v52  ;;  %v325_v54 = vpop.f32.mrb[1].mxu0 }
 0x11f   :  { %v143_v55 = vmax.f32 %v140_v53, 0.0 }
 0x121   :  { %359 = vmatmul.mubr.f32.vlgmr.msra.gmra.mrb[0].mxu1 %v143_v55 }
 0x1f4   :  { %v233_v57 = vpop.f32.mrb[0].mxu1 }
 0x1f5   :  { %v234_v58 = vadd.f32 %v256_v56, %v233_v57  ;;  %v360_v59 = vpop.f32.mrb[1].mxu1 }
 0x1f7   :  { %v237_v60 = vmax.f32 %v234_v58, 0.0 }
 0x1f9   :  { %238 = vst [vmem:[#allocation7] sm:$0xff] %v237_v60 }
 0x1fa   :  { %472 = shalt.err (!%p469_p6)
}
 0x1fb   :  { %s473_s26 = scalar_lea.hbm %s593_s5, 128 }
 0x1fc   :  { %p474_p7 = scmp.ne.s32.totalorder %s593_s5, %s473_s26  ;;  %p477_p8 = scmp.lt.u32.totalorder %s473_s26, %s593_s5 }
 0x1fe   :  { %p479_p9 = pnand %p477_p8, %p474_p7 }
 0x200   :  { %482 = shalt.err (!%p479_p9)
}
 0x201   :  { %248 = dma.vmem_to_hbm [thread:$0]  %s246_s23, 128, %s593_s5, [#allocation4]  }
 0x202   :  { %487 = dma.done.wait [#allocation4], 128  }
 0x203   :  { %488 = vsyncadd [#allocation4], 4294967168 }
 0x204   :  { %252 = vsyncpa [#allocation3], 1 }
 0x205   :  { %253 = vsyncpa [#allocation6], 1 }
 0x206   :  { %254 = vsyncpa [#allocation4], 1 }

</bundles_post_ra>
